<compile_context>
chip_gen: v5e
topology: v5e:2x2
jax: 0.10.0
libtpu: 0.0.40
codegen_flags: <defaults>
</compile_context>

<pallas_src>
import functools

import jax
import jax.numpy as jnp
from jax import lax
from jax.experimental import pallas as pl
from jax.experimental.pallas import tpu as pltpu

_LANES = 128
_SUBLANES = 8
_TARGET_TILE_BYTES = 4 << 20   # ~4 MiB of HBM bytes per input tile (per buffer)
_VMEM_LIMIT_BYTES = 48 << 20   # under v7x's 64 MiB physical VMEM, with headroom


def _round_up(x, m):
    return ((x + m - 1) // m) * m


def _apply_p(v, p):
    """v ** p with an integer-exponent fast path (pure VPU for integer p)."""
    if p == 1:
        return v
    if p == 2:
        return v * v
    if isinstance(p, int) and p > 0:
        return lax.integer_pow(v, p)
    # TODO(synk): non-integer p falls back to exp(p*log(v)) on the EUP.
    return jnp.power(v, jnp.float32(p))


def _elementwise(xv, p, onesided):
    """relu(-x*x)^p or |x-x|^p with minimal VALU ops (even-p trims abs/neg)."""
    even_p = isinstance(p, int) and p > 0 and (p % 2 == 0)
    if onesided:
        t = xv * xv
        # relu(-x*x) = -min(x*x, 0); for even p the sign is irrelevant.
        base = jnp.minimum(t, 0.0) if even_p else jnp.maximum(-t, 0.0)
    else:
        d = xv - xv                      # keeps NaN/Inf propagation
        base = d if even_p else jnp.abs(d)
    return _apply_p(base, p)


def _lpnorm_kernel(x_ref, o_ref, *, p, onesided, rows, block_rows, steps,
                   num_blocks, masked_tail):
    c = pl.program_id(0)   # "parallel" chunk axis (megacore sharding on v7x)
    s = pl.program_id(1)   # "arbitrary" sequential reduction axis

    @pl.when(s == 0)
    def _():
        o_ref[...] = jnp.zeros_like(o_ref)

    xv = x_ref[...].astype(jnp.float32)
    v = _elementwise(xv, p, onesided)

    def _partial_sum(t):
        # (block_rows, 128) -> (8, 128): sublane-aligned groups, pure VPU adds.
        return jnp.sum(t.reshape(block_rows // _SUBLANES, _SUBLANES, _LANES),
                       axis=0)

    if masked_tail:
        gi = c * steps + s
        is_tail = gi >= num_blocks - 1   # last real block and any phantom step

        @pl.when(jnp.logical_not(is_tail))
        def _():
            o_ref[...] += _partial_sum(v)

        @pl.when(is_tail)
        def _():
            # Mask on the accumulation side: ragged OOB rows of the last real
            # block and whole phantom steps (gi >= num_blocks) contribute 0,
            # so DMA'd garbage (possibly NaN) never reaches the accumulator.
            row_id = gi * block_rows + lax.broadcasted_iota(jnp.int32, v.shape, 0)
            o_ref[...] += _partial_sum(jnp.where(row_id < rows, v, 0.0))
    else:
        o_ref[...] += _partial_sum(v)


def lpnorm_metric(x_net, x, p=2, onesided=False):
    """Pallas implementation of LpNorm(p, onesided).forward(x_net, x).

    `x_net` is accepted for API parity but (per the reference code) unused.
    Requires p > 0 (as in the reference). Returns a float32 scalar.
    """
    del x_net  # unused in the reference forward
    assert p > 0, "LpNorm requires p > 0"
    x = jnp.asarray(x)
    n = x.size

    flat = jnp.ravel(x)                       # free bitcast for lane-dense inputs
    if n % _LANES != 0:
        # TODO(synk): the rare non-lane-aligned case still pays one padded-copy
        # pass; avoiding it fully would need a 1-D HBM view with manual DMA.
        flat = jnp.pad(flat, (0, _LANES - n % _LANES))
    rows = flat.size // _LANES
    x2 = flat.reshape(rows, _LANES)           # native dtype; f32 cast in-kernel

    # --- tile sizing: ~4 MiB of HBM bytes per tile, blocks balanced so the
    #     last tile is never nearly empty; always a multiple of 8 sublanes. ---
    itemsize = x2.dtype.itemsize
    target_rows = max(
        _SUBLANES,
        (_TARGET_TILE_BYTES // (_LANES * itemsize)) // _SUBLANES * _SUBLANES)
    nb_target = pl.cdiv(rows, target_rows)
    block_rows = min(target_rows, _round_up(pl.cdiv(rows, nb_target), _SUBLANES))
    num_blocks = pl.cdiv(rows, block_rows)

    # --- grid: always split >=2 blocks into 2 "parallel" chunks (both v7x
    #     TensorCores); odd block counts get one masked phantom step. Harmless
    #     (sequential, negligible extra index math) on single-core v5e/v6e. ---
    n_chunks = 2 if num_blocks >= 2 else 1
    steps = pl.cdiv(num_blocks, n_chunks)
    has_phantom = n_chunks * steps > num_blocks
    ragged = num_blocks * block_rows > rows
    masked_tail = ragged or has_phantom

    kernel = functools.partial(
        _lpnorm_kernel, p=p, onesided=onesided, rows=rows,
        block_rows=block_rows, steps=steps, num_blocks=num_blocks,
        masked_tail=masked_tail)

    def _in_index(c, s):
        # Clamp so a phantom step (odd num_blocks) re-reads the last real block
        # instead of issuing an out-of-range DMA; the kernel masks it to zero.
        return (jnp.minimum(c * steps + s, num_blocks - 1), 0)

    partials = pl.pallas_call(
        kernel,
        out_shape=jax.ShapeDtypeStruct((n_chunks * _SUBLANES, _LANES),
                                       jnp.float32),
        grid_spec=pltpu.PrefetchScalarGridSpec(
            num_scalar_prefetch=0,
            grid=(n_chunks, steps),
            in_specs=[pl.BlockSpec((block_rows, _LANES), _in_index)],
            # Output block index is constant over `s`, so it stays resident and
            # acts as the accumulator (no VMEM scratch, no copy epilogue).
            out_specs=pl.BlockSpec((_SUBLANES, _LANES), lambda c, s: (c, 0)),
        ),
        compiler_params=pltpu.CompilerParams(
            dimension_semantics=("parallel", "arbitrary"),
            vmem_limit_bytes=_VMEM_LIMIT_BYTES),
    )(x2)

    # Tiny partial-sum reduction + mean over the ORIGINAL element count n.
    return jnp.sum(partials) * jnp.float32(1.0 / n)


if __name__ == "__main__":
    key = jax.random.PRNGKey(0)
    k1, k2, k3, k4 = jax.random.split(key, 4)

    # NCHW inputs, small shapes (typical image usage of the module).
    x_net = jax.random.normal(k1, (2, 4, 16, 16), dtype=jnp.float32)
    x = jax.random.normal(k2, (2, 4, 16, 16), dtype=jnp.float32)

    # Default module config: p=2, onesided=False; also exercise onesided branch.
    d_two = jax.block_until_ready(lpnorm_metric(x_net, x, p=2, onesided=False))
    d_one = jax.block_until_ready(lpnorm_metric(x_net, x, p=2, onesided=True))

    ref_two = jnp.mean(jnp.abs(x - x) ** 2)
    ref_one = jnp.mean(jnp.maximum(-x * x, 0.0) ** 2)
    assert jnp.allclose(d_two, ref_two, atol=1e-6), (d_two, ref_two)
    assert jnp.allclose(d_one, ref_one, atol=1e-6), (d_one, ref_one)

    # Multi-block / ragged-tail / two-chunk / phantom-step path
    # (rows = 16400 -> 3 balanced blocks -> 2 chunks with one masked phantom).
    xr = jax.random.normal(k3, (2, 1, 8200, 128), dtype=jnp.float32)
    d_r = jax.block_until_ready(lpnorm_metric(None, xr, p=2, onesided=False))
    ref_r = jnp.mean(jnp.abs(xr - xr) ** 2)
    assert jnp.allclose(d_r, ref_r, atol=1e-6), (d_r, ref_r)

    # Non-lane-aligned + bf16 + odd-p onesided path.
    xs = jax.random.normal(k4, (3, 5, 7, 11), dtype=jnp.bfloat16)
    d_s = jax.block_until_ready(lpnorm_metric(None, xs, p=3, onesided=True))
    xsf = xs.astype(jnp.float32)
    ref_s = jnp.mean(jnp.maximum(-xsf * xsf, 0.0) ** 3)
    assert jnp.allclose(d_s, ref_s, atol=1e-6), (d_s, ref_s)

    print("KERNEL_OK")
</pallas_src>

<mosaic_0001>
module attributes {stable_mosaic.version = 11 : i64} {
  func.func @_lpnorm_kernel(%arg0: i32, %arg1: i32, %arg2: memref<16x128xf32, #tpu.memory_space<vmem>>, %arg3: memref<8x128xf32, #tpu.memory_space<vmem>>) attributes {dimension_semantics = [#tpu.dimension_semantics<parallel>, #tpu.dimension_semantics<arbitrary>], iteration_bounds = array<i64: 1, 1>, scalar_prefetch = 0 : i64, scratch_operands = 0 : i64, tpu.core_type = #tpu.core_type<tc>, window_params = [{transform_indices = @transform_0, window_bounds = array<i64: 16, 128>}, {transform_indices = @transform_1, window_bounds = array<i64: 8, 128>}]} {
    %c0_i32 = arith.constant 0 : i32
    %0 = arith.cmpi eq, %arg1, %c0_i32 : i32
    %1 = arith.extui %0 : i1 to i32
    %c0_i32_0 = arith.constant 0 : i32
    %2 = arith.cmpi ne, %1, %c0_i32_0 : i32
    scf.if %2 {
      %cst_6 = arith.constant 0.000000e+00 : f32
      %11 = vector.broadcast %cst_6 : f32 to vector<8x128xf32>
      %c0_7 = arith.constant 0 : index
      %c0_8 = arith.constant 0 : index
      %12 = vector.load %arg3[%c0_7, %c0_8] : memref<8x128xf32, #tpu.memory_space<vmem>>, vector<8x128xf32>
      tpu.vector_store %arg3[%c0_7, %c0_8], %11 {strides = array<i32>} : memref<8x128xf32, #tpu.memory_space<vmem>>, vector<8x128xf32>,
    } else {
    }
    %c0 = arith.constant 0 : index
    %c0_1 = arith.constant 0 : index
    %3 = vector.load %arg2[%c0, %c0_1] : memref<16x128xf32, #tpu.memory_space<vmem>>, vector<16x128xf32>
    %4 = arith.subf %3, %3 : vector<16x128xf32>
    %5 = arith.mulf %4, %4 : vector<16x128xf32>
    %c0_2 = arith.constant 0 : index
    %c0_3 = arith.constant 0 : index
    %6 = vector.load %arg3[%c0_2, %c0_3] : memref<8x128xf32, #tpu.memory_space<vmem>>, vector<8x128xf32>
    %7 = vector.shape_cast %5 : vector<16x128xf32> to vector<2x8x128xf32>
    %cst = arith.constant dense<0.000000e+00> : vector<8x128xf32>
    %8 = vector.multi_reduction <add>, %7, %cst [0] : vector<2x8x128xf32> to vector<8x128xf32>
    %9 = arith.addf %6, %8 : vector<8x128xf32>
    %c0_4 = arith.constant 0 : index
    %c0_5 = arith.constant 0 : index
    %10 = vector.load %arg3[%c0_4, %c0_5] : memref<8x128xf32, #tpu.memory_space<vmem>>, vector<8x128xf32>
    tpu.vector_store %arg3[%c0_4, %c0_5], %9 {strides = array<i32>} : memref<8x128xf32, #tpu.memory_space<vmem>>, vector<8x128xf32>,
    return
  }
  func.func @transform_0(%arg0: i32, %arg1: i32) -> (i32, i32) {
    %c1_i32 = arith.constant 1 : i32
    %0 = arith.muli %arg0, %c1_i32 : i32
    %1 = arith.addi %0, %arg1 : i32
    %c0_i32 = arith.constant 0 : i32
    %2 = arith.minsi %1, %c0_i32 : i32
    %c0_i32_0 = arith.constant 0 : i32
    %c0_i32_1 = arith.constant 0 : i32
    return %2, %c0_i32_0 : i32, i32
  }
  func.func @transform_1(%arg0: i32, %arg1: i32) -> (i32, i32) {
    %c0_i32 = arith.constant 0 : i32
    %c0_i32_0 = arith.constant 0 : i32
    return %arg0, %c0_i32 : i32, i32
  }
}

</mosaic_0001>

<bundles_post_ra>
// kernel: tpu_custom_call.1
= control target key start
LH: loop header
LB: loop body
LE: loop exit
PB: predicated region body
PF: predicated region fallthrough
CT: control target
= control target key end

     0   :  { %6 = vsyncpa [#allocation3], 0  ;;  %s146_s0 = inlined_call_operand.hbm [shape: f32[16,128], index: 0, kind: input, shape index: {}]   ;;  %s147_s1 = inlined_call_operand.hbm [shape: f32[8,128], index: 1, kind: output, shape index: {}]  }
   0x1   :  { %7 = vsyncpa [#allocation4], 0  ;;  %s18_s8 = sshll.u32 %s146_s0, 4  ;;  %s126_s9 = smov [#allocation2]   ;;  %s19_s8 = int_to_ptr.hbm [resolvable:$true] %s18_s8 }
   0x2   :  { %s20_s10 = sshll.u32 %s126_s9, 4  ;;  %s127_s11 = smov 128   ;;  %s21_s10 = int_to_ptr.vmem [resolvable:$true] %s20_s10 }
   0x3   :  { %s128_s12 = smov 8  }
   0x4   :  { %26 = dma.hbm_to_vmem [thread:$0]  %s19_s8, 256, %s21_s10, [#allocation3], %s127_s11, %s127_s11, %s128_s12  }
   0x5   :  { %122 = dma.done.wait [#allocation3], 256  }
   0x6   :  { %123 = vsyncadd [#allocation3], 4294967040  ;;  %v40_v0 = vld [vmem:[#allocation2] sm:$0xff]  ;;  %v41_v1 = vld [vmem:[#allocation2 + $0x8] sm:$0xff]  ;;  %s129_s13 = smov [#allocation5]   ;;  %s57_s0 = sshll.u32 %s147_s1, 4  ;;  %s58_s0 = int_to_ptr.hbm [resolvable:$true] %s57_s0 }
   0x7   :  { %v42_v2 = vsub.f32 %v40_v0, %v40_v0  ;;  %v43_v3 = vsub.f32 %v41_v1, %v41_v1  ;;  %s55_s14 = sshll.u32 %s129_s13, 4  ;;  %s56_s14 = int_to_ptr.vmem [resolvable:$true] %s55_s14 }
   0x9   :  { %v44_v4 = vmul.f32 %v42_v2, %v42_v2  ;;  %v45_v5 = vmul.f32 %v43_v3, %v43_v3 }
   0xb   :  { %v47_v6 = vadd.f32 %v45_v5, %v44_v4 }
   0xd   :  { %49 = vst [vmem:[#allocation5] sm:$0xff] %v47_v6 }
   0xe   :  { %60 = dma.vmem_to_hbm [thread:$0]  %s56_s14, 128, %s58_s0, [#allocation4]  }
   0xf   :  { %124 = dma.done.wait [#allocation4], 128  }
  0x10   :  { %125 = vsyncadd [#allocation4], 4294967168 }
  0x11   :  { %65 = vsyncpa [#allocation3], 1 }
  0x12   :  { %66 = vsyncpa [#allocation4], 1 }

</bundles_post_ra>
